<compile_context>
chip_gen: v7x
topology: tpu7x:2x2x1
jax: 0.10.0
libtpu: 0.0.40
codegen_flags: <defaults>
</compile_context>

<pallas_src>
import jax
import jax.numpy as jnp
from jax.experimental import pallas as pl
from jax.experimental.pallas import tpu as pltpu


_VMEM_LIMIT = 32 * 1024 * 1024   # explicit scoped-VMEM cap (safe on v5e/v6e/v7x)
_LRELU_SLOPE = 0.1               # matches nn.LeakyReLU(negative_slope=0.1)
# Matmul operand dtype. bf16 would double MXU throughput (and is the native
# path on v5e) but drifts past the 5e-3 check tolerance over 7 chained convs,
# so f32 operands + f32 accumulation are kept for exact semantic fidelity.
_MM_DTYPE = jnp.float32


def _pick_tile(hwp):
    """Largest lane-dense tile (multiple of 128) that divides the padded HW."""
    for t in (2048, 1024, 512, 256, 128):
        if hwp % t == 0:
            return t
    return hwp  # unreachable: hwp is always a multiple of 128


# ----------------------------------------------------------------------------
# Pallas kernels
# ----------------------------------------------------------------------------
def _make_conv_kernel(lrelu):
    """acc(Cout, THW) = W(Cout, K) @ col(K, THW) + bias, optional LeakyReLU."""
    def kernel(x_ref, w_ref, b_ref, o_ref):
        x = x_ref[0].astype(_MM_DTYPE)                       # (K, THW)
        w = w_ref[...].astype(_MM_DTYPE)                     # (Cout, K)
        acc = jnp.dot(w, x, preferred_element_type=jnp.float32)
        acc = acc + b_ref[0]                                 # (Cout, 1) lane-bcast
        if lrelu:
            acc = jnp.where(acc >= 0, acc, _LRELU_SLOPE * acc)
        o_ref[0] = acc.astype(o_ref.dtype)
    return kernel


def _conv56_kernel(x_ref, w5_ref, b5_ref, w6_ref, b6_ref, o_ref):
    """Fused conv5 + LeakyReLU + conv6(1x1); b6 already contains '+ m'."""
    x = x_ref[0].astype(_MM_DTYPE)                           # (K5, THW)
    h = jnp.dot(w5_ref[...].astype(_MM_DTYPE), x,
                preferred_element_type=jnp.float32) + b5_ref[0]
    h = jnp.where(h >= 0, h, _LRELU_SLOPE * h)
    out = jnp.dot(w6_ref[...].astype(_MM_DTYPE), h.astype(_MM_DTYPE),
                  preferred_element_type=jnp.float32) + b6_ref[0]
    o_ref[0] = out.astype(o_ref.dtype)


def _mean_kernel(x_ref, m_ref):
    """Spatial mean over the lane (H*W) axis per (batch, channel)."""
    x = x_ref[0]                                             # (C, HW)
    m_ref[0] = jnp.sum(x, axis=1, keepdims=True) * (1.0 / x.shape[1])


def pallas_spatial_mean(x_nchw):
    """x: (N, C, H, W) -> (N, C, 1) spatial mean."""
    N, C, H, W = x_nchw.shape
    x3 = x_nchw.reshape(N, C, H * W)
    return pl.pallas_call(
        _mean_kernel,
        grid=(N,),
        in_specs=[pl.BlockSpec((1, C, H * W), lambda n: (n, 0, 0))],
        out_specs=pl.BlockSpec((1, C, 1), lambda n: (n, 0, 0)),
        out_shape=jax.ShapeDtypeStruct((N, C, 1), jnp.float32),
        compiler_params=pltpu.CompilerParams(
            dimension_semantics=("parallel",),
            vmem_limit_bytes=_VMEM_LIMIT),
    )(x3)


# ----------------------------------------------------------------------------
# Glue: reflection pad + tap gathering (data movement only)
# ----------------------------------------------------------------------------
def _im2col(x, ksize, stride, refl_pad):
    """x (N,C,H,W) -> col (N, K*K*C, HWp) with HWp = HW padded to 128-multiple."""
    N, C, H, W = x.shape
    if refl_pad:
        x = jnp.pad(x, ((0, 0), (0, 0), (1, 1), (1, 1)), mode="reflect")
    Hp, Wp = x.shape[2], x.shape[3]
    Ho = (Hp - ksize) // stride + 1
    Wo = (Wp - ksize) // stride + 1
    taps = []
    for kh in range(ksize):
        for kw in range(ksize):
            taps.append(x[:, :,
                          kh:kh + stride * (Ho - 1) + 1:stride,
                          kw:kw + stride * (Wo - 1) + 1:stride])
    # tap-major (kh, kw), channel-minor ordering -> matches packed weights
    col = jnp.stack(taps, axis=1).reshape(N, ksize * ksize * C, Ho * Wo)
    hw = Ho * Wo
    hwp = -(-hw // 128) * 128
    if hwp != hw:
        col = jnp.pad(col, ((0, 0), (0, 0), (0, hwp - hw)))
    return col, Ho, Wo


# ----------------------------------------------------------------------------
# Conv layer wrapper (Pallas matmul kernels, lane-dense HW layout)
# ----------------------------------------------------------------------------
def conv_layer(x, w, b, *, ksize, stride=1, refl_pad=True, lrelu=True,
               fuse_1x1=None):
    """x (N,C,H,W); w packed (Cout, ksize*ksize*C); b (1 or N, Cout, 1)."""
    N = x.shape[0]
    col, Ho, Wo = _im2col(x, ksize, stride, refl_pad)
    _, K, HWp = col.shape
    HW = Ho * Wo
    THW = _pick_tile(HWp)
    grid = (N, HWp // THW)
    cparams = pltpu.CompilerParams(
        dimension_semantics=("parallel", "parallel"),
        vmem_limit_bytes=_VMEM_LIMIT)

    def bmap(barr):
        if barr.shape[0] == N:
            return lambda n, h: (n, 0, 0)       # per-batch (mean-folded) bias
        return lambda n, h: (0, 0, 0)           # shared bias

    col_spec = pl.BlockSpec((1, K, THW), lambda n, h: (n, 0, h))

    if fuse_1x1 is None:
        Cout = w.shape[0]
        out = pl.pallas_call(
            _make_conv_kernel(lrelu),
            grid=grid,
            in_specs=[col_spec,
                      pl.BlockSpec((Cout, K), lambda n, h: (0, 0)),
                      pl.BlockSpec((1, Cout, 1), bmap(b))],
            out_specs=pl.BlockSpec((1, Cout, THW), lambda n, h: (n, 0, h)),
            out_shape=jax.ShapeDtypeStruct((N, Cout, HWp), jnp.float32),
            compiler_params=cparams,
        )(col, w, b)
    else:
        w2, b2 = fuse_1x1
        Cmid, Cout = w.shape[0], w2.shape[0]
        out = pl.pallas_call(
            _conv56_kernel,
            grid=grid,
            in_specs=[col_spec,
                      pl.BlockSpec((Cmid, K), lambda n, h: (0, 0)),
                      pl.BlockSpec((1, Cmid, 1), bmap(b)),
                      pl.BlockSpec((Cout, Cmid), lambda n, h: (0, 0)),
                      pl.BlockSpec((1, Cout, 1), bmap(b2))],
            out_specs=pl.BlockSpec((1, Cout, THW), lambda n, h: (n, 0, h)),
            out_shape=jax.ShapeDtypeStruct((N, Cout, HWp), jnp.float32),
            compiler_params=cparams,
        )(col, w, b, w2, b2)

    return out[:, :, :HW].reshape(N, out.shape[1], Ho, Wo)


# ----------------------------------------------------------------------------
# Parameter packing (done once at load time)
# ----------------------------------------------------------------------------
def pack_params(params):
    """OIHW -> (Cout, KH*KW*Cin); bias -> (1, Cout, 1); plus conv0 tap-sum."""
    packed = {}
    for name, p in params.items():
        w = p["w"]
        cout, cin, kh, kw = w.shape
        packed[name] = {
            "w": jnp.transpose(w, (0, 2, 3, 1)).reshape(cout, kh * kw * cin),
            "b": p["b"].reshape(1, cout, 1),
        }
    packed["w0_sum"] = params["conv0"]["w"].sum(axis=(2, 3))   # (nf, 3)
    return packed


# ----------------------------------------------------------------------------
# Full forward pass (matches DirectKernelEstimator_CMS.forward)
# ----------------------------------------------------------------------------
def forward(x_nchw, packed):
    x = x_nchw.astype(jnp.float32)                              # NCHW already
    p = packed
    m = pallas_spatial_mean(x)                                  # (N, 3, 1)

    # conv0(pad(x - m)) == conv0(pad(x)) - (sum_taps W0) @ m  -> per-batch bias.
    b0 = p["conv0"]["b"] - jnp.einsum("oc,ncx->nox", p["w0_sum"], m)
    fea = conv_layer(x, p["conv0"]["w"], b0, ksize=3)
    fea = conv_layer(fea, p["conv1"]["w"], p["conv1"]["b"], ksize=3)
    fea = conv_layer(fea, p["conv2"]["w"], p["conv2"]["b"], ksize=3)
    fea = conv_layer(fea, p["conv3"]["w"], p["conv3"]["b"], ksize=4, stride=2)
    fea = conv_layer(fea, p["conv4"]["w"], p["conv4"]["b"], ksize=3)

    # conv5 + LeakyReLU + conv6(1x1) + '+ m' fused in one pallas_call.
    b6 = p["conv6"]["b"] + m                                    # (N, 3, 1)
    out = conv_layer(fea, p["conv5"]["w"], p["conv5"]["b"], ksize=3,
                     fuse_1x1=(p["conv6"]["w"], b6))
    return out                                                  # (N, 3, H/2, W/2)


# ----------------------------------------------------------------------------
# Deterministic parameter init (shapes from the module's __init__)
# ----------------------------------------------------------------------------
def init_params(key, nf):
    specs = [("conv0", 3, nf, 3), ("conv1", nf, nf, 3), ("conv2", nf, nf, 3),
             ("conv3", nf, nf * 2, 4), ("conv4", nf * 2, nf * 2, 3),
             ("conv5", nf * 2, nf, 3), ("conv6", nf, 3, 1)]
    params = {}
    for i, (name, cin, cout, k) in enumerate(specs):
        kw_, kb_ = jax.random.split(jax.random.fold_in(key, i))
        bound = 1.0 / float(cin * k * k) ** 0.5
        params[name] = {
            "w": jax.random.uniform(kw_, (cout, cin, k, k), jnp.float32,
                                    -bound, bound),
            "b": jax.random.uniform(kb_, (cout,), jnp.float32, -bound, bound),
        }
    return params


# ----------------------------------------------------------------------------
# Pure-JAX reference (sanity check)
# ----------------------------------------------------------------------------
def reference(x_nchw, params):
    x = jnp.transpose(x_nchw, (0, 2, 3, 1)).astype(jnp.float32)
    m = jnp.mean(x, axis=(1, 2), keepdims=True)

    def conv(v, w, b, stride, pad):
        if pad:
            v = jnp.pad(v, ((0, 0), (1, 1), (1, 1), (0, 0)), mode="reflect")
        w_hwio = jnp.transpose(w, (2, 3, 1, 0))
        y = jax.lax.conv_general_dilated(
            v, w_hwio, (stride, stride), "VALID",
            dimension_numbers=("NHWC", "HWIO", "NHWC"),
            precision=jax.lax.Precision.HIGHEST)
        return y + b

    lrelu = lambda v: jnp.where(v >= 0, v, 0.1 * v)
    p = params
    fea = lrelu(conv(x - m, p["conv0"]["w"], p["conv0"]["b"], 1, True))
    fea = lrelu(conv(fea, p["conv1"]["w"], p["conv1"]["b"], 1, True))
    fea = lrelu(conv(fea, p["conv2"]["w"], p["conv2"]["b"], 1, True))
    fea = lrelu(conv(fea, p["conv3"]["w"], p["conv3"]["b"], 2, True))
    fea = lrelu(conv(fea, p["conv4"]["w"], p["conv4"]["b"], 1, True))
    fea = lrelu(conv(fea, p["conv5"]["w"], p["conv5"]["b"], 1, True))
    out = conv(fea, p["conv6"]["w"], p["conv6"]["b"], 1, False) + m
    return jnp.transpose(out, (0, 3, 1, 2))


if __name__ == "__main__":
    key = jax.random.PRNGKey(0)
    nf = 8
    N, H, W = 2, 16, 16                      # input must have 3 channels
    params = init_params(jax.random.fold_in(key, 123), nf)
    x = jax.random.normal(jax.random.fold_in(key, 7), (N, 3, H, W), jnp.float32)

    packed = pack_params(params)             # one-time weight repacking
    out = jax.jit(forward)(x, packed)
    out = jax.block_until_ready(out)

    ref = reference(x, params)
    assert out.shape == (N, 3, H // 2, W // 2), out.shape
    err = float(jnp.max(jnp.abs(out - ref)))
    assert err < 5e-3, f"max abs err {err}"
    print("KERNEL_OK")
</pallas_src>

<mosaic_0001>
module attributes {stable_mosaic.version = 11 : i64} {
  func.func @_mean_kernel(%arg0: i32, %arg1: memref<1x3x256xf32, #tpu.memory_space<vmem>>, %arg2: memref<1x3x1xf32, #tpu.memory_space<vmem>>) attributes {dimension_semantics = [#tpu.dimension_semantics<parallel>], iteration_bounds = array<i64: 2>, scalar_prefetch = 0 : i64, scratch_operands = 0 : i64, tpu.core_type = #tpu.core_type<tc>, window_params = [{transform_indices = @transform_0, window_bounds = array<i64: 1, 3, 256>}, {transform_indices = @transform_1, window_bounds = array<i64: 1, 3, 1>}]} {
    %c0 = arith.constant 0 : index
    %c0_0 = arith.constant 0 : index
    %c0_1 = arith.constant 0 : index
    %0 = vector.load %arg1[%c0, %c0_0, %c0_1] : memref<1x3x256xf32, #tpu.memory_space<vmem>>, vector<1x3x256xf32>
    %1 = vector.shape_cast %0 : vector<1x3x256xf32> to vector<3x256xf32>
    %cst = arith.constant dense<0.000000e+00> : vector<3xf32>
    %2 = vector.multi_reduction <add>, %1, %cst [1] : vector<3x256xf32> to vector<3xf32>
    %3 = vector.shape_cast %2 : vector<3xf32> to vector<3x1xf32>
    %cst_2 = arith.constant 3.906250e-03 : f32
    %4 = vector.broadcast %cst_2 : f32 to vector<3x1xf32>
    %5 = arith.mulf %3, %4 : vector<3x1xf32>
    %c0_3 = arith.constant 0 : index
    %c0_4 = arith.constant 0 : index
    %c0_5 = arith.constant 0 : index
    %6 = vector.load %arg2[%c0_3, %c0_4, %c0_5] : memref<1x3x1xf32, #tpu.memory_space<vmem>>, vector<1x3x1xf32>
    %7 = vector.shape_cast %6 : vector<1x3x1xf32> to vector<3x1xf32>
    %8 = vector.shape_cast %5 : vector<3x1xf32> to vector<1x3x1xf32>
    tpu.vector_store %arg2[%c0_3, %c0_4, %c0_5], %8 {strides = array<i32>} : memref<1x3x1xf32, #tpu.memory_space<vmem>>, vector<1x3x1xf32>,
    return
  }
  func.func @transform_0(%arg0: i32) -> (i32, i32, i32) {
    %c0_i32 = arith.constant 0 : i32
    %c0_i32_0 = arith.constant 0 : i32
    %c0_i32_1 = arith.constant 0 : i32
    return %arg0, %c0_i32, %c0_i32_0 : i32, i32, i32
  }
  func.func @transform_1(%arg0: i32) -> (i32, i32, i32) {
    %c0_i32 = arith.constant 0 : i32
    %c0_i32_0 = arith.constant 0 : i32
    %c0_i32_1 = arith.constant 0 : i32
    return %arg0, %c0_i32, %c0_i32_0 : i32, i32, i32
  }
}

module attributes {stable_mosaic.version = 11 : i64} {
  func.func @kernel(%arg0: i32, %arg1: i32, %arg2: memref<1x27x256xf32, #tpu.memory_space<vmem>>, %arg3: memref<8x27xf32, #tpu.memory_space<vmem>>, %arg4: memref<1x8x1xf32, #tpu.memory_space<vmem>>, %arg5: memref<1x8x256xf32, #tpu.memory_space<vmem>>) attributes {dimension_semantics = [#tpu.dimension_semantics<parallel>, #tpu.dimension_semantics<parallel>], iteration_bounds = array<i64: 2, 1>, scalar_prefetch = 0 : i64, scratch_operands = 0 : i64, tpu.core_type = #tpu.core_type<tc>, window_params = [{transform_indices = @transform_0, window_bounds = array<i64: 1, 27, 256>}, {pipeline_mode = #tpu.pipeline_mode<synchronous>, transform_indices = @transform_1, window_bounds = array<i64: 8, 27>}, {transform_indices = @transform_2, window_bounds = array<i64: 1, 8, 1>}, {transform_indices = @transform_3, window_bounds = array<i64: 1, 8, 256>}]} {
    %c0 = arith.constant 0 : index
    %c0_0 = arith.constant 0 : index
    %c0_1 = arith.constant 0 : index
    %0 = vector.load %arg2[%c0, %c0_0, %c0_1] : memref<1x27x256xf32, #tpu.memory_space<vmem>>, vector<1x27x256xf32>
    %1 = vector.shape_cast %0 : vector<1x27x256xf32> to vector<27x256xf32>
    %c0_2 = arith.constant 0 : index
    %c0_3 = arith.constant 0 : index
    %2 = vector.load %arg3[%c0_2, %c0_3] : memref<8x27xf32, #tpu.memory_space<vmem>>, vector<8x27xf32>
    %cst = arith.constant dense<0.000000e+00> : vector<8x256xf32>
    %3 = tpu.matmul %2, %1, %cst {dimension_numbers = #tpu.dot_dimension_numbers<[1], [0], [0], [1], [0, 0, 1, 1], [], []>} : vector<8x27xf32>, vector<27x256xf32>, vector<8x256xf32> -> vector<8x256xf32>
    %c0_4 = arith.constant 0 : index
    %c0_5 = arith.constant 0 : index
    %c0_6 = arith.constant 0 : index
    %4 = vector.load %arg4[%c0_4, %c0_5, %c0_6] : memref<1x8x1xf32, #tpu.memory_space<vmem>>, vector<1x8x1xf32>
    %5 = vector.shape_cast %4 : vector<1x8x1xf32> to vector<8x1xf32>
    %6 = vector.broadcast %5 : vector<8x1xf32> to vector<8x256xf32>
    %7 = arith.addf %3, %6 : vector<8x256xf32>
    %cst_7 = arith.constant 0.000000e+00 : f32
    %8 = vector.broadcast %cst_7 : f32 to vector<8x256xf32>
    %9 = arith.cmpf oge, %7, %8 : vector<8x256xf32>
    %cst_8 = arith.constant 1.000000e-01 : f32
    %10 = vector.broadcast %cst_8 : f32 to vector<8x256xf32>
    %11 = arith.mulf %10, %7 : vector<8x256xf32>
    %12 = arith.select %9, %7, %11 : vector<8x256xi1>, vector<8x256xf32>
    %c0_9 = arith.constant 0 : index
    %c0_10 = arith.constant 0 : index
    %c0_11 = arith.constant 0 : index
    %13 = vector.load %arg5[%c0_9, %c0_10, %c0_11] : memref<1x8x256xf32, #tpu.memory_space<vmem>>, vector<1x8x256xf32>
    %14 = vector.shape_cast %13 : vector<1x8x256xf32> to vector<8x256xf32>
    %15 = vector.shape_cast %12 : vector<8x256xf32> to vector<1x8x256xf32>
    tpu.vector_store %arg5[%c0_9, %c0_10, %c0_11], %15 {strides = array<i32>} : memref<1x8x256xf32, #tpu.memory_space<vmem>>, vector<1x8x256xf32>,
    return
  }
  func.func @transform_0(%arg0: i32, %arg1: i32) -> (i32, i32, i32) {
    %c0_i32 = arith.constant 0 : i32
    %c0_i32_0 = arith.constant 0 : i32
    return %arg0, %c0_i32, %arg1 : i32, i32, i32
  }
  func.func @transform_1(%arg0: i32, %arg1: i32) -> (i32, i32) {
    %c0_i32 = arith.constant 0 : i32
    %c0_i32_0 = arith.constant 0 : i32
    %c0_i32_1 = arith.constant 0 : i32
    return %c0_i32, %c0_i32_0 : i32, i32
  }
  func.func @transform_2(%arg0: i32, %arg1: i32) -> (i32, i32, i32) {
    %c0_i32 = arith.constant 0 : i32
    %c0_i32_0 = arith.constant 0 : i32
    %c0_i32_1 = arith.constant 0 : i32
    return %arg0, %c0_i32, %c0_i32_0 : i32, i32, i32
  }
  func.func @transform_3(%arg0: i32, %arg1: i32) -> (i32, i32, i32) {
    %c0_i32 = arith.constant 0 : i32
    %c0_i32_0 = arith.constant 0 : i32
    return %arg0, %c0_i32, %arg1 : i32, i32, i32
  }
}

module attributes {stable_mosaic.version = 11 : i64} {
  func.func @kernel(%arg0: i32, %arg1: i32, %arg2: memref<1x72x256xf32, #tpu.memory_space<vmem>>, %arg3: memref<8x72xf32, #tpu.memory_space<vmem>>, %arg4: memref<1x8x1xf32, #tpu.memory_space<vmem>>, %arg5: memref<1x8x256xf32, #tpu.memory_space<vmem>>) attributes {dimension_semantics = [#tpu.dimension_semantics<parallel>, #tpu.dimension_semantics<parallel>], iteration_bounds = array<i64: 2, 1>, scalar_prefetch = 0 : i64, scratch_operands = 0 : i64, tpu.core_type = #tpu.core_type<tc>, window_params = [{transform_indices = @transform_0, window_bounds = array<i64: 1, 72, 256>}, {pipeline_mode = #tpu.pipeline_mode<synchronous>, transform_indices = @transform_1, window_bounds = array<i64: 8, 72>}, {pipeline_mode = #tpu.pipeline_mode<synchronous>, transform_indices = @transform_2, window_bounds = array<i64: 1, 8, 1>}, {transform_indices = @transform_3, window_bounds = array<i64: 1, 8, 256>}]} {
    %c0 = arith.constant 0 : index
    %c0_0 = arith.constant 0 : index
    %c0_1 = arith.constant 0 : index
    %0 = vector.load %arg2[%c0, %c0_0, %c0_1] : memref<1x72x256xf32, #tpu.memory_space<vmem>>, vector<1x72x256xf32>
    %1 = vector.shape_cast %0 : vector<1x72x256xf32> to vector<72x256xf32>
    %c0_2 = arith.constant 0 : index
    %c0_3 = arith.constant 0 : index
    %2 = vector.load %arg3[%c0_2, %c0_3] : memref<8x72xf32, #tpu.memory_space<vmem>>, vector<8x72xf32>
    %cst = arith.constant dense<0.000000e+00> : vector<8x256xf32>
    %3 = tpu.matmul %2, %1, %cst {dimension_numbers = #tpu.dot_dimension_numbers<[1], [0], [0], [1], [0, 0, 1, 1], [], []>} : vector<8x72xf32>, vector<72x256xf32>, vector<8x256xf32> -> vector<8x256xf32>
    %c0_4 = arith.constant 0 : index
    %c0_5 = arith.constant 0 : index
    %c0_6 = arith.constant 0 : index
    %4 = vector.load %arg4[%c0_4, %c0_5, %c0_6] : memref<1x8x1xf32, #tpu.memory_space<vmem>>, vector<1x8x1xf32>
    %5 = vector.shape_cast %4 : vector<1x8x1xf32> to vector<8x1xf32>
    %6 = vector.broadcast %5 : vector<8x1xf32> to vector<8x256xf32>
    %7 = arith.addf %3, %6 : vector<8x256xf32>
    %cst_7 = arith.constant 0.000000e+00 : f32
    %8 = vector.broadcast %cst_7 : f32 to vector<8x256xf32>
    %9 = arith.cmpf oge, %7, %8 : vector<8x256xf32>
    %cst_8 = arith.constant 1.000000e-01 : f32
    %10 = vector.broadcast %cst_8 : f32 to vector<8x256xf32>
    %11 = arith.mulf %10, %7 : vector<8x256xf32>
    %12 = arith.select %9, %7, %11 : vector<8x256xi1>, vector<8x256xf32>
    %c0_9 = arith.constant 0 : index
    %c0_10 = arith.constant 0 : index
    %c0_11 = arith.constant 0 : index
    %13 = vector.load %arg5[%c0_9, %c0_10, %c0_11] : memref<1x8x256xf32, #tpu.memory_space<vmem>>, vector<1x8x256xf32>
    %14 = vector.shape_cast %13 : vector<1x8x256xf32> to vector<8x256xf32>
    %15 = vector.shape_cast %12 : vector<8x256xf32> to vector<1x8x256xf32>
    tpu.vector_store %arg5[%c0_9, %c0_10, %c0_11], %15 {strides = array<i32>} : memref<1x8x256xf32, #tpu.memory_space<vmem>>, vector<1x8x256xf32>,
    return
  }
  func.func @transform_0(%arg0: i32, %arg1: i32) -> (i32, i32, i32) {
    %c0_i32 = arith.constant 0 : i32
    %c0_i32_0 = arith.constant 0 : i32
    return %arg0, %c0_i32, %arg1 : i32, i32, i32
  }
  func.func @transform_1(%arg0: i32, %arg1: i32) -> (i32, i32) {
    %c0_i32 = arith.constant 0 : i32
    %c0_i32_0 = arith.constant 0 : i32
    %c0_i32_1 = arith.constant 0 : i32
    return %c0_i32, %c0_i32_0 : i32, i32
  }
  func.func @transform_2(%arg0: i32, %arg1: i32) -> (i32, i32, i32) {
    %c0_i32 = arith.constant 0 : i32
    %c0_i32_0 = arith.constant 0 : i32
    %c0_i32_1 = arith.constant 0 : i32
    %c0_i32_2 = arith.constant 0 : i32
    return %c0_i32, %c0_i32_0, %c0_i32_1 : i32, i32, i32
  }
  func.func @transform_3(%arg0: i32, %arg1: i32) -> (i32, i32, i32) {
    %c0_i32 = arith.constant 0 : i32
    %c0_i32_0 = arith.constant 0 : i32
    return %arg0, %c0_i32, %arg1 : i32, i32, i32
  }
}

module attributes {stable_mosaic.version = 11 : i64} {
  func.func @kernel(%arg0: i32, %arg1: i32, %arg2: memref<1x128x128xf32, #tpu.memory_space<vmem>>, %arg3: memref<16x128xf32, #tpu.memory_space<vmem>>, %arg4: memref<1x16x1xf32, #tpu.memory_space<vmem>>, %arg5: memref<1x16x128xf32, #tpu.memory_space<vmem>>) attributes {dimension_semantics = [#tpu.dimension_semantics<parallel>, #tpu.dimension_semantics<parallel>], iteration_bounds = array<i64: 2, 1>, scalar_prefetch = 0 : i64, scratch_operands = 0 : i64, tpu.core_type = #tpu.core_type<tc>, window_params = [{transform_indices = @transform_0, window_bounds = array<i64: 1, 128, 128>}, {pipeline_mode = #tpu.pipeline_mode<synchronous>, transform_indices = @transform_1, window_bounds = array<i64: 16, 128>}, {pipeline_mode = #tpu.pipeline_mode<synchronous>, transform_indices = @transform_2, window_bounds = array<i64: 1, 16, 1>}, {transform_indices = @transform_3, window_bounds = array<i64: 1, 16, 128>}]} {
    %c0 = arith.constant 0 : index
    %c0_0 = arith.constant 0 : index
    %c0_1 = arith.constant 0 : index
    %0 = vector.load %arg2[%c0, %c0_0, %c0_1] : memref<1x128x128xf32, #tpu.memory_space<vmem>>, vector<1x128x128xf32>
    %1 = vector.shape_cast %0 : vector<1x128x128xf32> to vector<128x128xf32>
    %c0_2 = arith.constant 0 : index
    %c0_3 = arith.constant 0 : index
    %2 = vector.load %arg3[%c0_2, %c0_3] : memref<16x128xf32, #tpu.memory_space<vmem>>, vector<16x128xf32>
    %cst = arith.constant dense<0.000000e+00> : vector<16x128xf32>
    %3 = tpu.matmul %2, %1, %cst {dimension_numbers = #tpu.dot_dimension_numbers<[1], [0], [0], [1], [0, 0, 1, 1], [], []>} : vector<16x128xf32>, vector<128x128xf32>, vector<16x128xf32> -> vector<16x128xf32>
    %c0_4 = arith.constant 0 : index
    %c0_5 = arith.constant 0 : index
    %c0_6 = arith.constant 0 : index
    %4 = vector.load %arg4[%c0_4, %c0_5, %c0_6] : memref<1x16x1xf32, #tpu.memory_space<vmem>>, vector<1x16x1xf32>
    %5 = vector.shape_cast %4 : vector<1x16x1xf32> to vector<16x1xf32>
    %6 = vector.broadcast %5 : vector<16x1xf32> to vector<16x128xf32>
    %7 = arith.addf %3, %6 : vector<16x128xf32>
    %cst_7 = arith.constant 0.000000e+00 : f32
    %8 = vector.broadcast %cst_7 : f32 to vector<16x128xf32>
    %9 = arith.cmpf oge, %7, %8 : vector<16x128xf32>
    %cst_8 = arith.constant 1.000000e-01 : f32
    %10 = vector.broadcast %cst_8 : f32 to vector<16x128xf32>
    %11 = arith.mulf %10, %7 : vector<16x128xf32>
    %12 = arith.select %9, %7, %11 : vector<16x128xi1>, vector<16x128xf32>
    %c0_9 = arith.constant 0 : index
    %c0_10 = arith.constant 0 : index
    %c0_11 = arith.constant 0 : index
    %13 = vector.load %arg5[%c0_9, %c0_10, %c0_11] : memref<1x16x128xf32, #tpu.memory_space<vmem>>, vector<1x16x128xf32>
    %14 = vector.shape_cast %13 : vector<1x16x128xf32> to vector<16x128xf32>
    %15 = vector.shape_cast %12 : vector<16x128xf32> to vector<1x16x128xf32>
    tpu.vector_store %arg5[%c0_9, %c0_10, %c0_11], %15 {strides = array<i32>} : memref<1x16x128xf32, #tpu.memory_space<vmem>>, vector<1x16x128xf32>,
    return
  }
  func.func @transform_0(%arg0: i32, %arg1: i32) -> (i32, i32, i32) {
    %c0_i32 = arith.constant 0 : i32
    %c0_i32_0 = arith.constant 0 : i32
    return %arg0, %c0_i32, %arg1 : i32, i32, i32
  }
  func.func @transform_1(%arg0: i32, %arg1: i32) -> (i32, i32) {
    %c0_i32 = arith.constant 0 : i32
    %c0_i32_0 = arith.constant 0 : i32
    %c0_i32_1 = arith.constant 0 : i32
    return %c0_i32, %c0_i32_0 : i32, i32
  }
  func.func @transform_2(%arg0: i32, %arg1: i32) -> (i32, i32, i32) {
    %c0_i32 = arith.constant 0 : i32
    %c0_i32_0 = arith.constant 0 : i32
    %c0_i32_1 = arith.constant 0 : i32
    %c0_i32_2 = arith.constant 0 : i32
    return %c0_i32, %c0_i32_0, %c0_i32_1 : i32, i32, i32
  }
  func.func @transform_3(%arg0: i32, %arg1: i32) -> (i32, i32, i32) {
    %c0_i32 = arith.constant 0 : i32
    %c0_i32_0 = arith.constant 0 : i32
    return %arg0, %c0_i32, %arg1 : i32, i32, i32
  }
}

module attributes {stable_mosaic.version = 11 : i64} {
  func.func @kernel(%arg0: i32, %arg1: i32, %arg2: memref<1x144x128xf32, #tpu.memory_space<vmem>>, %arg3: memref<16x144xf32, #tpu.memory_space<vmem>>, %arg4: memref<1x16x1xf32, #tpu.memory_space<vmem>>, %arg5: memref<1x16x128xf32, #tpu.memory_space<vmem>>) attributes {dimension_semantics = [#tpu.dimension_semantics<parallel>, #tpu.dimension_semantics<parallel>], iteration_bounds = array<i64: 2, 1>, scalar_prefetch = 0 : i64, scratch_operands = 0 : i64, tpu.core_type = #tpu.core_type<tc>, window_params = [{transform_indices = @transform_0, window_bounds = array<i64: 1, 144, 128>}, {pipeline_mode = #tpu.pipeline_mode<synchronous>, transform_indices = @transform_1, window_bounds = array<i64: 16, 144>}, {pipeline_mode = #tpu.pipeline_mode<synchronous>, transform_indices = @transform_2, window_bounds = array<i64: 1, 16, 1>}, {transform_indices = @transform_3, window_bounds = array<i64: 1, 16, 128>}]} {
    %c0 = arith.constant 0 : index
    %c0_0 = arith.constant 0 : index
    %c0_1 = arith.constant 0 : index
    %0 = vector.load %arg2[%c0, %c0_0, %c0_1] : memref<1x144x128xf32, #tpu.memory_space<vmem>>, vector<1x144x128xf32>
    %1 = vector.shape_cast %0 : vector<1x144x128xf32> to vector<144x128xf32>
    %c0_2 = arith.constant 0 : index
    %c0_3 = arith.constant 0 : index
    %2 = vector.load %arg3[%c0_2, %c0_3] : memref<16x144xf32, #tpu.memory_space<vmem>>, vector<16x144xf32>
    %cst = arith.constant dense<0.000000e+00> : vector<16x128xf32>
    %3 = tpu.matmul %2, %1, %cst {dimension_numbers = #tpu.dot_dimension_numbers<[1], [0], [0], [1], [0, 0, 1, 1], [], []>} : vector<16x144xf32>, vector<144x128xf32>, vector<16x128xf32> -> vector<16x128xf32>
    %c0_4 = arith.constant 0 : index
    %c0_5 = arith.constant 0 : index
    %c0_6 = arith.constant 0 : index
    %4 = vector.load %arg4[%c0_4, %c0_5, %c0_6] : memref<1x16x1xf32, #tpu.memory_space<vmem>>, vector<1x16x1xf32>
    %5 = vector.shape_cast %4 : vector<1x16x1xf32> to vector<16x1xf32>
    %6 = vector.broadcast %5 : vector<16x1xf32> to vector<16x128xf32>
    %7 = arith.addf %3, %6 : vector<16x128xf32>
    %cst_7 = arith.constant 0.000000e+00 : f32
    %8 = vector.broadcast %cst_7 : f32 to vector<16x128xf32>
    %9 = arith.cmpf oge, %7, %8 : vector<16x128xf32>
    %cst_8 = arith.constant 1.000000e-01 : f32
    %10 = vector.broadcast %cst_8 : f32 to vector<16x128xf32>
    %11 = arith.mulf %10, %7 : vector<16x128xf32>
    %12 = arith.select %9, %7, %11 : vector<16x128xi1>, vector<16x128xf32>
    %c0_9 = arith.constant 0 : index
    %c0_10 = arith.constant 0 : index
    %c0_11 = arith.constant 0 : index
    %13 = vector.load %arg5[%c0_9, %c0_10, %c0_11] : memref<1x16x128xf32, #tpu.memory_space<vmem>>, vector<1x16x128xf32>
    %14 = vector.shape_cast %13 : vector<1x16x128xf32> to vector<16x128xf32>
    %15 = vector.shape_cast %12 : vector<16x128xf32> to vector<1x16x128xf32>
    tpu.vector_store %arg5[%c0_9, %c0_10, %c0_11], %15 {strides = array<i32>} : memref<1x16x128xf32, #tpu.memory_space<vmem>>, vector<1x16x128xf32>,
    return
  }
  func.func @transform_0(%arg0: i32, %arg1: i32) -> (i32, i32, i32) {
    %c0_i32 = arith.constant 0 : i32
    %c0_i32_0 = arith.constant 0 : i32
    return %arg0, %c0_i32, %arg1 : i32, i32, i32
  }
  func.func @transform_1(%arg0: i32, %arg1: i32) -> (i32, i32) {
    %c0_i32 = arith.constant 0 : i32
    %c0_i32_0 = arith.constant 0 : i32
    %c0_i32_1 = arith.constant 0 : i32
    return %c0_i32, %c0_i32_0 : i32, i32
  }
  func.func @transform_2(%arg0: i32, %arg1: i32) -> (i32, i32, i32) {
    %c0_i32 = arith.constant 0 : i32
    %c0_i32_0 = arith.constant 0 : i32
    %c0_i32_1 = arith.constant 0 : i32
    %c0_i32_2 = arith.constant 0 : i32
    return %c0_i32, %c0_i32_0, %c0_i32_1 : i32, i32, i32
  }
  func.func @transform_3(%arg0: i32, %arg1: i32) -> (i32, i32, i32) {
    %c0_i32 = arith.constant 0 : i32
    %c0_i32_0 = arith.constant 0 : i32
    return %arg0, %c0_i32, %arg1 : i32, i32, i32
  }
}

module attributes {stable_mosaic.version = 11 : i64} {
  func.func @_conv56_kernel(%arg0: i32, %arg1: i32, %arg2: memref<1x144x128xf32, #tpu.memory_space<vmem>>, %arg3: memref<8x144xf32, #tpu.memory_space<vmem>>, %arg4: memref<1x8x1xf32, #tpu.memory_space<vmem>>, %arg5: memref<3x8xf32, #tpu.memory_space<vmem>>, %arg6: memref<1x3x1xf32, #tpu.memory_space<vmem>>, %arg7: memref<1x3x128xf32, #tpu.memory_space<vmem>>) attributes {dimension_semantics = [#tpu.dimension_semantics<parallel>, #tpu.dimension_semantics<parallel>], iteration_bounds = array<i64: 2, 1>, scalar_prefetch = 0 : i64, scratch_operands = 0 : i64, tpu.core_type = #tpu.core_type<tc>, window_params = [{transform_indices = @transform_0, window_bounds = array<i64: 1, 144, 128>}, {pipeline_mode = #tpu.pipeline_mode<synchronous>, transform_indices = @transform_1, window_bounds = array<i64: 8, 144>}, {pipeline_mode = #tpu.pipeline_mode<synchronous>, transform_indices = @transform_2, window_bounds = array<i64: 1, 8, 1>}, {pipeline_mode = #tpu.pipeline_mode<synchronous>, transform_indices = @transform_3, window_bounds = array<i64: 3, 8>}, {transform_indices = @transform_4, window_bounds = array<i64: 1, 3, 1>}, {transform_indices = @transform_5, window_bounds = array<i64: 1, 3, 128>}]} {
    %c0 = arith.constant 0 : index
    %c0_0 = arith.constant 0 : index
    %c0_1 = arith.constant 0 : index
    %0 = vector.load %arg2[%c0, %c0_0, %c0_1] : memref<1x144x128xf32, #tpu.memory_space<vmem>>, vector<1x144x128xf32>
    %1 = vector.shape_cast %0 : vector<1x144x128xf32> to vector<144x128xf32>
    %c0_2 = arith.constant 0 : index
    %c0_3 = arith.constant 0 : index
    %2 = vector.load %arg3[%c0_2, %c0_3] : memref<8x144xf32, #tpu.memory_space<vmem>>, vector<8x144xf32>
    %cst = arith.constant dense<0.000000e+00> : vector<8x128xf32>
    %3 = tpu.matmul %2, %1, %cst {dimension_numbers = #tpu.dot_dimension_numbers<[1], [0], [0], [1], [0, 0, 1, 1], [], []>} : vector<8x144xf32>, vector<144x128xf32>, vector<8x128xf32> -> vector<8x128xf32>
    %c0_4 = arith.constant 0 : index
    %c0_5 = arith.constant 0 : index
    %c0_6 = arith.constant 0 : index
    %4 = vector.load %arg4[%c0_4, %c0_5, %c0_6] : memref<1x8x1xf32, #tpu.memory_space<vmem>>, vector<1x8x1xf32>
    %5 = vector.shape_cast %4 : vector<1x8x1xf32> to vector<8x1xf32>
    %6 = vector.broadcast %5 : vector<8x1xf32> to vector<8x128xf32>
    %7 = arith.addf %3, %6 : vector<8x128xf32>
    %cst_7 = arith.constant 0.000000e+00 : f32
    %8 = vector.broadcast %cst_7 : f32 to vector<8x128xf32>
    %9 = arith.cmpf oge, %7, %8 : vector<8x128xf32>
    %cst_8 = arith.constant 1.000000e-01 : f32
    %10 = vector.broadcast %cst_8 : f32 to vector<8x128xf32>
    %11 = arith.mulf %10, %7 : vector<8x128xf32>
    %12 = arith.select %9, %7, %11 : vector<8x128xi1>, vector<8x128xf32>
    %c0_9 = arith.constant 0 : index
    %c0_10 = arith.constant 0 : index
    %13 = vector.load %arg5[%c0_9, %c0_10] : memref<3x8xf32, #tpu.memory_space<vmem>>, vector<3x8xf32>
    %cst_11 = arith.constant dense<0.000000e+00> : vector<3x128xf32>
    %14 = tpu.matmul %13, %12, %cst_11 {dimension_numbers = #tpu.dot_dimension_numbers<[1], [0], [0], [1], [0, 0, 1, 1], [], []>} : vector<3x8xf32>, vector<8x128xf32>, vector<3x128xf32> -> vector<3x128xf32>
    %c0_12 = arith.constant 0 : index
    %c0_13 = arith.constant 0 : index
    %c0_14 = arith.constant 0 : index
    %15 = vector.load %arg6[%c0_12, %c0_13, %c0_14] : memref<1x3x1xf32, #tpu.memory_space<vmem>>, vector<1x3x1xf32>
    %16 = vector.shape_cast %15 : vector<1x3x1xf32> to vector<3x1xf32>
    %17 = vector.broadcast %16 : vector<3x1xf32> to vector<3x128xf32>
    %18 = arith.addf %14, %17 : vector<3x128xf32>
    %c0_15 = arith.constant 0 : index
    %c0_16 = arith.constant 0 : index
    %c0_17 = arith.constant 0 : index
    %19 = vector.load %arg7[%c0_15, %c0_16, %c0_17] : memref<1x3x128xf32, #tpu.memory_space<vmem>>, vector<1x3x128xf32>
    %20 = vector.shape_cast %19 : vector<1x3x128xf32> to vector<3x128xf32>
    %21 = vector.shape_cast %18 : vector<3x128xf32> to vector<1x3x128xf32>
    tpu.vector_store %arg7[%c0_15, %c0_16, %c0_17], %21 {strides = array<i32>} : memref<1x3x128xf32, #tpu.memory_space<vmem>>, vector<1x3x128xf32>,
    return
  }
  func.func @transform_0(%arg0: i32, %arg1: i32) -> (i32, i32, i32) {
    %c0_i32 = arith.constant 0 : i32
    %c0_i32_0 = arith.constant 0 : i32
    return %arg0, %c0_i32, %arg1 : i32, i32, i32
  }
  func.func @transform_1(%arg0: i32, %arg1: i32) -> (i32, i32) {
    %c0_i32 = arith.constant 0 : i32
    %c0_i32_0 = arith.constant 0 : i32
    %c0_i32_1 = arith.constant 0 : i32
    return %c0_i32, %c0_i32_0 : i32, i32
  }
  func.func @transform_2(%arg0: i32, %arg1: i32) -> (i32, i32, i32) {
    %c0_i32 = arith.constant 0 : i32
    %c0_i32_0 = arith.constant 0 : i32
    %c0_i32_1 = arith.constant 0 : i32
    %c0_i32_2 = arith.constant 0 : i32
    return %c0_i32, %c0_i32_0, %c0_i32_1 : i32, i32, i32
  }
  func.func @transform_3(%arg0: i32, %arg1: i32) -> (i32, i32) {
    %c0_i32 = arith.constant 0 : i32
    %c0_i32_0 = arith.constant 0 : i32
    %c0_i32_1 = arith.constant 0 : i32
    return %c0_i32, %c0_i32_0 : i32, i32
  }
  func.func @transform_4(%arg0: i32, %arg1: i32) -> (i32, i32, i32) {
    %c0_i32 = arith.constant 0 : i32
    %c0_i32_0 = arith.constant 0 : i32
    %c0_i32_1 = arith.constant 0 : i32
    return %arg0, %c0_i32, %c0_i32_0 : i32, i32, i32
  }
  func.func @transform_5(%arg0: i32, %arg1: i32) -> (i32, i32, i32) {
    %c0_i32 = arith.constant 0 : i32
    %c0_i32_0 = arith.constant 0 : i32
    return %arg0, %c0_i32, %arg1 : i32, i32, i32
  }
}

</mosaic_0001>

<bundles_post_ra>
// kernel: forward.7
= control target key start
LH: loop header
LB: loop body
LE: loop exit
PB: predicated region body
PF: predicated region fallthrough
CT: control target
= control target key end

     0   :  { %s219_s6 = smov 0   ;;  %s230_s0 = inlined_call_operand.vmem [shape: f32[2,3,256], index: 0, kind: input, shape index: {}]   ;;  %s231_s1 = inlined_call_operand.vmem [shape: f32[2,3,1], index: 1, kind: output, shape index: {}]  }
   0x1 LB: > { %s181_s7 = sadd.s32 4294967295, %s207_s6   ;;  %p185_p0 = scmp.ge.s32.totalorder %s207_s6, 1  ;;  %s207_s6 = sphi %s219_s6, %s11_s6  }
   0x2   : > { %p87_p1 = scmp.lt.s32.totalorder %s207_s6, 3 }
   0x4   : > { %p88_p2 = pnand %p185_p0, %p87_p1 }
   0x5   : > { %p106_p3 = scmp.lt.s32.totalorder (!%p88_p2), %s181_s7, 1  ;;  %vm119_vm0 = vcmask (!%p88_p2), 1042432   ;;  %vm126_vm1 = vcmask (!%p88_p2), 2048  }
   0x6   : > { %91 = sbr.rel (%p88_p2) target bundleno = 167 (0xa7), region = 24 }
   0xd   : > { %s233_s7 = smov (!%p106_p3, %s181_s7), 1 }
   0xe   : > { %s191_s8 = sshll.u32 %s233_s7, 3  ;;  %s188_s12 = sshll.u32 %s233_s7, 2 }
   0xf   : > { %s110_s11 = scalar_lea.vmem %s230_s0, %s191_s8  ;;  %s114_s15 = scalar_lea.vmem %s231_s1, %s188_s12 }
  0x10   : > { %v115_v0 = vld [vmem:[%s110_s11] sm:$0x77] }
  0x11   : > { %v117_v1 = vcombine.high %v115_v0, %v115_v0  ;;  %v120_v2 = vsel %vm119_vm0, %v115_v0, 0.0 }
  0x13   : > { %v121_v3 = vsel %vm119_vm0, %v117_v1, 0.0 }
  0x14   : > { %v122_v4 = vadd.f32 %v121_v3, %v120_v2 }
  0x16   : > { %123 = vadd.xlane.f32.xlu0 %v122_v4 }
  0xa3   : > { %v124_v5 = vpop.xlane.xlu0 %123 }
  0xa4   : > { %v125_v6 = vmul.f32 0.00390625, %v124_v5 }
  0xa6   : > { %127 = vst.msk [vmem:[%s114_s15] sm:$0x7] %vm126_vm1, %v125_v6 }
  0xa7 PF: > { %s11_s6 = sadd.s32 1, %s207_s6  }
  0xa8   : > { %p8_p4 = scmp.ge.s32.totalorder %s11_s6, 4  }
  0xaa   :  { %10 = sbr.rel (!%p8_p4) target bundleno = 1 (0x1), region = 54 }

// kernel: forward.8
= control target key start
LH: loop header
LB: loop body
LE: loop exit
PB: predicated region body
PF: predicated region fallthrough
CT: control target
= control target key end

     0   :  { %s533_s12 = smov 0   ;;  %s535_s13 = smov 0   ;;  %s585_s0 = inlined_call_operand.vmem [shape: f32[2,27,256], index: 0, kind: input, shape index: {}]   ;;  %s586_s1 = inlined_call_operand.vmem [shape: f32[8,27], index: 1, kind: input, shape index: {}]   ;;  %s587_s2 = inlined_call_operand.vmem [shape: f32[2,8,1], index: 2, kind: input, shape index: {}]   ;;  %s588_s3 = inlined_call_operand.vmem [shape: f32[2,8,256], index: 3, kind: output, shape index: {}]  }
   0x1   :  { %s537_s14 = smov 0  }
   0x2 LB: > { %s25_s15 = sadd.s32 1, %s504_s13  ;;  %p435_p0 = scmp.ge.s32.totalorder %s508_s14, 1  ;;  %s508_s14 = sphi %s537_s14, %s13_s14   ;;  %s504_s13 = sphi %s535_s13, %s592_s13   ;;  %s500_s12 = sphi %s533_s12, %s591_s12  }
   0x3   : > { %p27_p1 = scmp.ge.s32.totalorder %s25_s15, 2  ;;  %p167_p2 = scmp.lt.s32.totalorder %s508_s14, 3 }
   0x5   : > { %s594_s15 = smov (%p27_p1, %s25_s15), 0  ;;  %p168_p3 = pnand %p435_p0, %p167_p2 }
   0x6   : > { %p204_p4 = scmp.lt.s32.totalorder (!%p168_p3), %s500_s12, 1  ;;  %v510_v0 = vmov (!%p168_p3), 0.0   ;;  %vm246_vm0 = vcmask (!%p168_p3), 1042432   ;;  %v511_v1 = vmov (!%p168_p3), 0   ;;  %vm512_vm1 = vmmov (!%p168_p3), 1   ;;  %v235_v16 = vld [vmem:[%s586_s1] sm:$0xff] (!%p168_p3) }
   0x7   : > { %171 = sbr.rel (%p168_p3) target bundleno = 247 (0xf7), region = 32  ;;  %317 = vmatprep.mubr.f32.mxu0 (!%p168_p3), %v510_v0  ;;  %485 = vset.pattern.permute.xlu0 (!%p168_p3), %v511_v1  ;;  %vm558_vm2 = vmpackc.low (!%p168_p3), %vm246_vm0, %vm512_vm1  ;;  %vm242_vm3 = vcmask (!%p168_p3), 220160  }
   0xe   : > { %s596_s12 = smov (!%p204_p4, %s500_s12), 1 }
   0xf   : > { %s446_s16 = sshll.u32 %s596_s12, 6  ;;  %s438_s17 = sshll.u32 %s596_s12, 3 }
  0x10   : > { %s211_s20 = scalar_lea.vmem %s585_s0, %s446_s16  ;;  %s216_s23 = scalar_lea.vmem %s587_s2, %s438_s17 }
  0x11   : > { %v228_v3 = vld [vmem:[%s211_s20 + $0x8] sm:$0xff]  ;;  %v230_v4 = vld [vmem:[%s211_s20 + $0x18] sm:$0xff]  ;;  %v227_v5 = vld [vmem:[%s211_s20] sm:$0xff]  ;;  %s447_s26 = sshll.u32 %s596_s12, 4 }
  0x12   : > { %v448_v6 = vpack.c.bf16 %v230_v4, %v228_v3  ;;  %v229_v7 = vld [vmem:[%s211_s20 + $0x10] sm:$0xff]  ;;  %v232_v8 = vld [vmem:[%s211_s20 + $0x28] sm:$0xff]  ;;  %v234_v9 = vld [vmem:[%s211_s20 + $0x38] sm:$0x7]  ;;  %s225_s29 = scalar_lea.vmem %s588_s3, %s447_s26 }
  0x13   : > { %v450_v10 = vpack.c.bf16 %v229_v7, %v227_v5  ;;  %v452_v11 = vpack.c.bf16 %v234_v9, %v232_v8  ;;  %v231_v12 = vld [vmem:[%s211_s20 + $0x20] sm:$0xff]  ;;  %v233_v13 = vld [vmem:[%s211_s20 + $0x30] sm:$0x7] }
  0x14   : > { %v236_v14 = vld [vmem:[%s216_s23] sm:$0xff]  ;;  %449 = vmatprep.subr.bf16.mxu0 %v448_v6  ;;  %v455_v15 = vpack.c.bf16 %v233_v13, %v231_v12 }
  0x15   : > { %239 = vperm.xlu0 %485, %v236_v14   ;;  %451 = vmatpush1.bf16.msra.mxu0 %v450_v10 }
  0x16   : > { %454 = vmatprep.subr.msk.bf16.mxu0 %vm558_vm2, %v452_v11 }
  0x19   : > { %457 = vmatpush1.bf16.msk.msra.mxu0 %vm558_vm2, %v455_v15 }
  0x1c   : > { %443 = vmatmul.mubr.msk.f32.vlgmr.msra.gmra.mrb[0].mxu0 %vm242_vm3, %v235_v16 }
  0x94   : > { %v240_v17 = vpop.permute.xlu0 %239 }
  0xef   : > { %v319_v18 = vpop.f32.mrb[0].mxu0 }
  0xf0   : > { %v320_v19 = vadd.f32 %v319_v18, %v240_v17  ;;  %v321_v20 = vpop.f32.mrb[1].mxu0 }
  0xf1   : > { %v322_v21 = vadd.f32 %v321_v20, %v240_v17 }
  0xf2   : > { %vm324_vm4 = vcmp.ge.f32.partialorder %v320_v19, 0.0  ;;  %v326_v22 = vmul.f32 0.1, %v320_v19 }
  0xf3   : > { %vm325_vm5 = vcmp.ge.f32.partialorder %v322_v21, 0.0  ;;  %v327_v23 = vmul.f32 0.1, %v322_v21 }
  0xf4   : > { %v328_v24 = vsel %vm324_vm4, %v320_v19, %v326_v22 }
  0xf5   : > { %330 = vst [vmem:[%s225_s29] sm:$0xff] %v328_v24  ;;  %v329_v25 = vsel %vm325_vm5, %v322_v21, %v327_v23 }
  0xf6   : > { %331 = vst [vmem:[%s225_s29 + $0x8] sm:$0xff] %v329_v25 }
  0xf7 PF: > { %s13_s14 = sadd.s32 1, %s508_s14   ;;  %s591_s12 = smov %s504_s13 }
  0xf8   : > { %p10_p5 = scmp.ge.s32.totalorder %s13_s14, 4   ;;  %s592_s13 = smov %s594_s15 }
  0xfa   :  { %12 = sbr.rel (!%p10_p5) target bundleno = 2 (0x2), region = 65 }

// kernel: forward.9
= control target key start
LH: loop header
LB: loop body
LE: loop exit
PB: predicated region body
PF: predicated region fallthrough
CT: control target
= control target key end

     0   :  { %s507_s12 = smov 0   ;;  %s509_s13 = smov 0   ;;  %s570_s0 = inlined_call_operand.vmem [shape: f32[2,72,256], index: 0, kind: input, shape index: {}]   ;;  %s571_s1 = inlined_call_operand.vmem [shape: f32[8,72], index: 1, kind: input, shape index: {}]   ;;  %s572_s2 = inlined_call_operand.vmem [shape: f32[1,8,1], index: 2, kind: input, shape index: {}]   ;;  %s573_s3 = inlined_call_operand.vmem [shape: f32[2,8,256], index: 3, kind: output, shape index: {}]  }
   0x1   :  { %s511_s14 = smov 0  }
   0x2 LB: > { %s25_s15 = sadd.s32 1, %s479_s13  ;;  %p409_p0 = scmp.ge.s32.totalorder %s483_s14, 1  ;;  %s483_s14 = sphi %s511_s14, %s13_s14   ;;  %s479_s13 = sphi %s509_s13, %s575_s13   ;;  %s475_s12 = sphi %s507_s12, %s574_s12  }
   0x3   : > { %p27_p1 = scmp.ge.s32.totalorder %s25_s15, 2  ;;  %p158_p2 = scmp.lt.s32.totalorder %s483_s14, 3 }
   0x5   : > { %s577_s15 = smov (%p27_p1, %s25_s15), 0  ;;  %p159_p3 = pnand %p409_p0, %p158_p2 }
   0x6   : > { %p191_p4 = scmp.lt.s32.totalorder (!%p159_p3), %s475_s12, 1  ;;  %v229_v0 = vld [vmem:[%s572_s2] sm:$0xff] (!%p159_p3)  ;;  %v485_v1 = vmov (!%p159_p3), 0.0   ;;  %v486_v2 = vmov (!%p159_p3), 0   ;;  %vm235_vm0 = vcmask (!%p159_p3), 588800  }
   0x7   : > { %162 = sbr.rel (%p159_p3) target bundleno = 258 (0x102), region = 32  ;;  %303 = vmatprep.mubr.f32.mxu0 (!%p159_p3), %v485_v1  ;;  %460 = vset.pattern.permute.xlu0 (!%p159_p3), %v486_v2  ;;  %v228_v29 = vld [vmem:[%s571_s1] sm:$0xff] (!%p159_p3) }
   0x8   : > { %232 = vperm.xlu0 (!%p159_p3), %460, %v229_v0  }
   0xe   : > { %s579_s12 = smov (!%p191_p4, %s475_s12), 1 }
   0xf   : > { %s433_s18 = smul.u32 144, %s579_s12  ;;  %s416_s24 = sshll.u32 %s579_s12, 4 }
  0x10   : > { %s208_s27 = scalar_lea.vmem %s573_s3, %s416_s24 }
  0x11   : > { %s534_s21 = scalar_lea.vmem %s570_s0, %s433_s18 }
  0x12   : > { %v211_v3 = vld [vmem:[%s534_s21 + $0x8] sm:$0xff]  ;;  %v213_v4 = vld [vmem:[%s534_s21 + $0x18] sm:$0xff]  ;;  %v210_v5 = vld [vmem:[%s534_s21] sm:$0xff] }
  0x13   : > { %v417_v6 = vpack.c.bf16 %v213_v4, %v211_v3  ;;  %v212_v7 = vld [vmem:[%s534_s21 + $0x10] sm:$0xff]  ;;  %v215_v8 = vld [vmem:[%s534_s21 + $0x28] sm:$0xff]  ;;  %v217_v9 = vld [vmem:[%s534_s21 + $0x38] sm:$0xff] }
  0x14   : > { %v419_v10 = vpack.c.bf16 %v212_v7, %v210_v5  ;;  %v421_v11 = vpack.c.bf16 %v217_v9, %v215_v8  ;;  %v214_v12 = vld [vmem:[%s534_s21 + $0x20] sm:$0xff]  ;;  %v216_v13 = vld [vmem:[%s534_s21 + $0x30] sm:$0xff]  ;;  %v219_v14 = vld [vmem:[%s534_s21 + $0x48] sm:$0xff] }
  0x15   : > { %418 = vmatprep.subr.bf16.mxu0 %v417_v6  ;;  %v221_v15 = vld [vmem:[%s534_s21 + $0x58] sm:$0xff]  ;;  %v423_v16 = vpack.c.bf16 %v216_v13, %v214_v12  ;;  %v218_v18 = vld [vmem:[%s534_s21 + $0x40] sm:$0xff]  ;;  %v220_v19 = vld [vmem:[%s534_s21 + $0x50] sm:$0xff] }
  0x16   : > { %420 = vmatpush1.bf16.msra.mxu0 %v419_v10  ;;  %v425_v17 = vpack.c.bf16 %v221_v15, %v219_v14  ;;  %v223_v20 = vld [vmem:[%s534_s21 + $0x68] sm:$0xff]  ;;  %v225_v21 = vld [vmem:[%s534_s21 + $0x78] sm:$0xff]  ;;  %v427_v22 = vpack.c.bf16 %v220_v19, %v218_v18  ;;  %v222_v24 = vld [vmem:[%s534_s21 + $0x60] sm:$0xff] }
  0x17   : > { %422 = vmatprep.subr.bf16.mxu0 %v421_v11  ;;  %v429_v23 = vpack.c.bf16 %v225_v21, %v223_v20  ;;  %v224_v25 = vld [vmem:[%s534_s21 + $0x70] sm:$0xff]  ;;  %v227_v27 = vld [vmem:[%s534_s21 + $0x88] sm:$0xff]  ;;  %v226_v28 = vld [vmem:[%s534_s21 + $0x80] sm:$0xff] }
  0x18   : > { %v431_v26 = vpack.c.bf16 %v224_v25, %v222_v24 }
  0x1a   : > { %424 = vmatpush1.bf16.msra.mxu0 %v423_v16 }
  0x1b   : > { %426 = vmatprep.subr.bf16.mxu0 %v425_v17 }
  0x1e   : > { %428 = vmatpush1.bf16.msra.mxu0 %v427_v22 }
  0x1f   : > { %430 = vmatprep.subr.bf16.mxu0 %v429_v23 }
  0x22   : > { %432 = vmatpush1.bf16.msra.mxu0 %v431_v26 }
  0x23   : > { %255 = vmatprep.subr.mxu0 %v227_v27 }
  0x26   : > { %256 = vmatpush1.msra.mxu0 %v226_v28 }
  0x27   : > { %413 = vmatmul.mubr.msk.f32.vlgmr.msra.gmra.mrb[0].mxu0 %vm235_vm0, %v228_v29 }
  0x87   : > { %v233_v30 = vpop.permute.xlu0 %232 }
  0xfa   : > { %v305_v31 = vpop.f32.mrb[0].mxu0 }
  0xfb   : > { %v306_v32 = vadd.f32 %v305_v31, %v233_v30  ;;  %v307_v33 = vpop.f32.mrb[1].mxu0 }
  0xfc   : > { %v308_v34 = vadd.f32 %v307_v33, %v233_v30 }
  0xfd   : > { %vm310_vm1 = vcmp.ge.f32.partialorder %v306_v32, 0.0  ;;  %v312_v35 = vmul.f32 0.1, %v306_v32 }
  0xfe   : > { %vm311_vm2 = vcmp.ge.f32.partialorder %v308_v34, 0.0  ;;  %v313_v36 = vmul.f32 0.1, %v308_v34 }
  0xff   : > { %v314_v37 = vsel %vm310_vm1, %v306_v32, %v312_v35 }
 0x100   : > { %316 = vst [vmem:[%s208_s27] sm:$0xff] %v314_v37  ;;  %v315_v38 = vsel %vm311_vm2, %v308_v34, %v313_v36 }
 0x101   : > { %317 = vst [vmem:[%s208_s27 + $0x8] sm:$0xff] %v315_v38 }
 0x102 PF: > { %s13_s14 = sadd.s32 1, %s483_s14   ;;  %s574_s12 = smov %s479_s13 }
 0x103   : > { %p10_p5 = scmp.ge.s32.totalorder %s13_s14, 4   ;;  %s575_s13 = smov %s577_s15 }
 0x105   :  { %12 = sbr.rel (!%p10_p5) target bundleno = 2 (0x2), region = 62 }

// kernel: forward.11
= control target key start
LH: loop header
LB: loop body
LE: loop exit
PB: predicated region body
PF: predicated region fallthrough
CT: control target
= control target key end

     0   :  { %s567_s12 = smov 0   ;;  %s569_s13 = smov 0   ;;  %s634_s0 = inlined_call_operand.vmem [shape: f32[2,128,128], index: 0, kind: input, shape index: {}]   ;;  %s635_s1 = inlined_call_operand.vmem [shape: f32[16,128], index: 1, kind: input, shape index: {}]   ;;  %s636_s2 = inlined_call_operand.vmem [shape: f32[1,16,1], index: 2, kind: input, shape index: {}]   ;;  %s637_s3 = inlined_call_operand.vmem [shape: f32[2,16,128], index: 3, kind: output, shape index: {}]  }
   0x1   :  { %s571_s14 = smov 0  }
   0x2 LB: > { %s25_s15 = sadd.s32 1, %s540_s13  ;;  %p402_p0 = scmp.ge.s32.totalorder %s544_s14, 1  ;;  %s544_s14 = sphi %s571_s14, %s13_s14   ;;  %s540_s13 = sphi %s569_s13, %s639_s13   ;;  %s536_s12 = sphi %s567_s12, %s638_s12  }
   0x3   : > { %p27_p1 = scmp.ge.s32.totalorder %s25_s15, 2  ;;  %p156_p2 = scmp.lt.s32.totalorder %s544_s14, 3 }
   0x5   : > { %s641_s15 = smov (%p27_p1, %s25_s15), 0  ;;  %p157_p3 = pnand %p402_p0, %p156_p2 }
   0x6   : > { %p186_p4 = scmp.lt.s32.totalorder (!%p157_p3), %s536_s12, 1  ;;  %v218_v0 = vld [vmem:[%s635_s1] sm:$0xff] (!%p157_p3)  ;;  %v546_v2 = vmov (!%p157_p3), 0   ;;  %v221_v3 = vld [vmem:[%s636_s2 + $0x8] sm:$0xff] (!%p157_p3) }
   0x7   : > { %160 = sbr.rel (%p157_p3) target bundleno = 271 (0x10f), region = 32  ;;  %v220_v1 = vld [vmem:[%s636_s2] sm:$0xff] (!%p157_p3)  ;;  %461 = vmatprep.mubr.f32.mxu0 (!%p157_p3), %v218_v0  ;;  %521 = vset.pattern.permute.xlu0 (!%p157_p3), %v546_v2  ;;  %v219_v28 = vld [vmem:[%s635_s1 + $0x8] sm:$0xff] (!%p157_p3) }
   0x8   : > { %224 = vperm.xlu0 (!%p157_p3), %521, %v220_v1  }
   0xc   : > { %229 = vperm.xlu0 (!%p157_p3), %521, %v221_v3  }
   0xe   : > { %s643_s12 = smov (!%p186_p4, %s536_s12), 1 }
   0xf   : > { %s409_s22 = sshll.u32 %s643_s12, 7  ;;  %s410_s28 = sshll.u32 %s643_s12, 4 }
  0x10   : > { %s600_s25 = scalar_lea.vmem %s634_s0, %s409_s22  ;;  %s201_s4 = scalar_lea.vmem %s637_s3, %s410_s28 }
  0x11   : > { %v202_v4 = vld [vmem:[%s600_s25] sm:$0xff]  ;;  %v203_v5 = vld [vmem:[%s600_s25 + $0x8] sm:$0xff]  ;;  %v204_v6 = vld [vmem:[%s600_s25 + $0x10] sm:$0xff] }
  0x12   : > { %v464_v7 = vpack.c.bf16 %v203_v5, %v202_v4  ;;  %v205_v8 = vld [vmem:[%s600_s25 + $0x18] sm:$0xff]  ;;  %v206_v10 = vld [vmem:[%s600_s25 + $0x20] sm:$0xff]  ;;  %v207_v11 = vld [vmem:[%s600_s25 + $0x28] sm:$0xff] }
  0x13   : > { %v468_v9 = vpack.c.bf16 %v205_v8, %v204_v6  ;;  %v472_v12 = vpack.c.bf16 %v207_v11, %v206_v10  ;;  %v208_v13 = vld [vmem:[%s600_s25 + $0x30] sm:$0xff]  ;;  %v209_v14 = vld [vmem:[%s600_s25 + $0x38] sm:$0xff]  ;;  %v210_v16 = vld [vmem:[%s600_s25 + $0x40] sm:$0xff] }
  0x14   : > { %465 = vmatprep.subr.bf16.mxu0 %v464_v7  ;;  %v476_v15 = vpack.c.bf16 %v209_v14, %v208_v13  ;;  %v211_v17 = vld [vmem:[%s600_s25 + $0x48] sm:$0xff]  ;;  %v212_v19 = vld [vmem:[%s600_s25 + $0x50] sm:$0xff]  ;;  %v213_v20 = vld [vmem:[%s600_s25 + $0x58] sm:$0xff] }
  0x15   : > { %467 = vmatpush3.bf16.msra.mxu0 %v464_v7  ;;  %v480_v18 = vpack.c.bf16 %v211_v17, %v210_v16  ;;  %v484_v21 = vpack.c.bf16 %v213_v20, %v212_v19  ;;  %v214_v22 = vld [vmem:[%s600_s25 + $0x60] sm:$0xff]  ;;  %v215_v23 = vld [vmem:[%s600_s25 + $0x68] sm:$0xff]  ;;  %v216_v25 = vld [vmem:[%s600_s25 + $0x70] sm:$0xff] }
  0x16   : > { %469 = vmatprep.subr.bf16.mxu0 %v468_v9  ;;  %v488_v24 = vpack.c.bf16 %v215_v23, %v214_v22  ;;  %v217_v26 = vld [vmem:[%s600_s25 + $0x78] sm:$0xff] }
  0x17   : > { %v492_v27 = vpack.c.bf16 %v217_v26, %v216_v25 }
  0x19   : > { %471 = vmatpush3.bf16.msra.mxu0 %v468_v9 }
  0x1a   : > { %473 = vmatprep.subr.bf16.mxu0 %v472_v12 }
  0x1d   : > { %475 = vmatpush3.bf16.msra.mxu0 %v472_v12 }
  0x1e   : > { %477 = vmatprep.subr.bf16.mxu0 %v476_v15 }
  0x21   : > { %479 = vmatpush3.bf16.msra.mxu0 %v476_v15 }
  0x22   : > { %481 = vmatprep.subr.bf16.mxu0 %v480_v18 }
  0x25   : > { %483 = vmatpush3.bf16.msra.mxu0 %v480_v18 }
  0x26   : > { %485 = vmatprep.subr.bf16.mxu0 %v484_v21 }
  0x29   : > { %487 = vmatpush3.bf16.msra.mxu0 %v484_v21 }
  0x2a   : > { %489 = vmatprep.subr.bf16.mxu0 %v488_v24 }
  0x2d   : > { %491 = vmatpush3.bf16.msra.mxu0 %v488_v24 }
  0x2e   : > { %493 = vmatprep.subr.bf16.mxu0 %v492_v27 }
  0x31   : > { %495 = vmatpush3.bf16.msra.mxu0 %v492_v27 }
  0x34   : > { %462 = vmatmul.mubr.f32.vlgmr.msra.gmra.mrb[0].mxu0 %v219_v28 }
  0x87   : > { %v225_v29 = vpop.permute.xlu0 %224 }
  0x8b   : > { %v230_v30 = vpop.permute.xlu0 %229 }
 0x107   : > { %v463_v31 = vpop.f32.mrb[0].mxu0 }
 0x108   : > { %v304_v32 = vadd.f32 %v463_v31, %v230_v30  ;;  %v298_v33 = vpop.f32.mrb[1].mxu0 }
 0x109   : > { %v299_v34 = vadd.f32 %v298_v33, %v225_v29 }
 0x10a   : > { %vm308_vm0 = vcmp.ge.f32.partialorder %v304_v32, 0.0  ;;  %v310_v35 = vmul.f32 0.1, %v304_v32 }
 0x10b   : > { %vm307_vm1 = vcmp.ge.f32.partialorder %v299_v34, 0.0  ;;  %v309_v36 = vmul.f32 0.1, %v299_v34 }
 0x10c   : > { %v312_v37 = vsel %vm308_vm0, %v304_v32, %v310_v35 }
 0x10d   : > { %314 = vst [vmem:[%s201_s4 + $0x8] sm:$0xff] %v312_v37  ;;  %v311_v38 = vsel %vm307_vm1, %v299_v34, %v309_v36 }
 0x10e   : > { %313 = vst [vmem:[%s201_s4] sm:$0xff] %v311_v38 }
 0x10f PF: > { %s13_s14 = sadd.s32 1, %s544_s14   ;;  %s638_s12 = smov %s540_s13 }
 0x110   : > { %p10_p5 = scmp.ge.s32.totalorder %s13_s14, 4   ;;  %s639_s13 = smov %s641_s15 }
 0x112   :  { %12 = sbr.rel (!%p10_p5) target bundleno = 2 (0x2), region = 62 }

// kernel: forward.12
= control target key start
LH: loop header
LB: loop body
LE: loop exit
PB: predicated region body
PF: predicated region fallthrough
CT: control target
= control target key end

     0   :  { %s541_s12 = smov 0   ;;  %s543_s13 = smov 0   ;;  %s634_s0 = inlined_call_operand.vmem [shape: f32[2,144,128], index: 0, kind: input, shape index: {}]   ;;  %s635_s1 = inlined_call_operand.vmem [shape: f32[16,144], index: 1, kind: input, shape index: {}]   ;;  %s636_s2 = inlined_call_operand.vmem [shape: f32[1,16,1], index: 2, kind: input, shape index: {}]   ;;  %s637_s3 = inlined_call_operand.vmem [shape: f32[2,16,128], index: 3, kind: output, shape index: {}]  }
   0x1   :  { %s545_s14 = smov 0  }
   0x2 LB: > { %s25_s15 = sadd.s32 1, %s513_s13  ;;  %p413_p0 = scmp.ge.s32.totalorder %s517_s14, 1  ;;  %s517_s14 = sphi %s545_s14, %s13_s14   ;;  %s513_s13 = sphi %s543_s13, %s639_s13   ;;  %s509_s12 = sphi %s541_s12, %s638_s12  }
   0x3   : > { %p27_p1 = scmp.ge.s32.totalorder %s25_s15, 2  ;;  %p156_p2 = scmp.lt.s32.totalorder %s517_s14, 3 }
   0x5   : > { %s641_s15 = smov (%p27_p1, %s25_s15), 0  ;;  %p157_p3 = pnand %p413_p0, %p156_p2 }
   0x6   : > { %p186_p4 = scmp.lt.s32.totalorder (!%p157_p3), %s509_s12, 1  ;;  %v221_v0 = vld [vmem:[%s635_s1 + $0x8] sm:$0xff] (!%p157_p3)  ;;  %vm236_vm0 = vcmask (!%p157_p3), 130048   ;;  %v223_v1 = vld [vmem:[%s635_s1 + $0x18] sm:$0xff] (!%p157_p3)  ;;  %v519_v2 = vmov (!%p157_p3), 0.0|0.0   ;;  %v224_v3 = vld [vmem:[%s636_s2] sm:$0xff] (!%p157_p3) }
   0x7   : > { %160 = sbr.rel (%p157_p3) target bundleno = 274 (0x112), region = 32  ;;  %422 = vmatprep.subr.bf16.mxu0 (!%p157_p3), %v519_v2  ;;  %449 = vmatprep.subr.bf16.mxu1 (!%p157_p3), %v519_v2  ;;  %v520_v4 = vmov (!%p157_p3), 0   ;;  %v225_v5 = vld [vmem:[%s636_s2 + $0x8] sm:$0xff] (!%p157_p3)  ;;  %v220_v33 = vld [vmem:[%s635_s1] sm:$0xff] (!%p157_p3)  ;;  %v222_v34 = vld [vmem:[%s635_s1 + $0x10] sm:$0xff] (!%p157_p3) }
   0x8   : > { %417 = vmatprep.mubr.msk.f32.mxu0 (!%p157_p3), %vm236_vm0, %v221_v0  ;;  %418 = vmatprep.mubr.msk.f32.mxu1 (!%p157_p3), %vm236_vm0, %v223_v1 }
   0x9   : > { %494 = vset.pattern.permute.xlu0 (!%p157_p3), %v520_v4 }
   0xa   : > { %228 = vperm.xlu0 (!%p157_p3), %494, %v224_v3  }
   0xe   : > { %s643_s12 = smov (!%p186_p4, %s509_s12), 1  ;;  %233 = vperm.xlu0 %494, %v225_v5  }
   0xf   : > { %s467_s22 = smul.u32 144, %s643_s12  ;;  %s421_s5 = sshll.u32 %s643_s12, 4 }
  0x10   : > { %s201_s8 = scalar_lea.vmem %s637_s3, %s421_s5 }
  0x11   : > { %s579_s27 = scalar_lea.vmem %s634_s0, %s467_s22 }
  0x12   : > { %v202_v6 = vld [vmem:[%s579_s27] sm:$0xff]  ;;  %v203_v7 = vld [vmem:[%s579_s27 + $0x8] sm:$0xff]  ;;  %v204_v8 = vld [vmem:[%s579_s27 + $0x10] sm:$0xff] }
  0x13   : > { %v423_v9 = vpack.c.bf16 %v203_v7, %v202_v6  ;;  %v205_v10 = vld [vmem:[%s579_s27 + $0x18] sm:$0xff]  ;;  %v206_v12 = vld [vmem:[%s579_s27 + $0x20] sm:$0xff]  ;;  %v207_v13 = vld [vmem:[%s579_s27 + $0x28] sm:$0xff] }
  0x14   : > { %v426_v11 = vpack.c.bf16 %v205_v10, %v204_v8  ;;  %v429_v14 = vpack.c.bf16 %v207_v13, %v206_v12  ;;  %v208_v15 = vld [vmem:[%s579_s27 + $0x30] sm:$0xff]  ;;  %v209_v16 = vld [vmem:[%s579_s27 + $0x38] sm:$0xff]  ;;  %v210_v18 = vld [vmem:[%s579_s27 + $0x40] sm:$0xff] }
  0x15   : > { %424 = vmatpush1.bf16.msra.mxu0 %v423_v9  ;;  %458 = vmatpush1.bf16.msra.mxu1 %v423_v9  ;;  %v432_v17 = vpack.c.bf16 %v209_v16, %v208_v15  ;;  %v211_v19 = vld [vmem:[%s579_s27 + $0x48] sm:$0xff]  ;;  %v212_v21 = vld [vmem:[%s579_s27 + $0x50] sm:$0xff]  ;;  %v213_v22 = vld [vmem:[%s579_s27 + $0x58] sm:$0xff] }
  0x16   : > { %425 = vmatprep.subr.bf16.mxu0 %v519_v2  ;;  %450 = vmatprep.subr.bf16.mxu1 %v519_v2  ;;  %v435_v20 = vpack.c.bf16 %v211_v19, %v210_v18  ;;  %v438_v23 = vpack.c.bf16 %v213_v22, %v212_v21  ;;  %v214_v24 = vld [vmem:[%s579_s27 + $0x60] sm:$0xff]  ;;  %v215_v25 = vld [vmem:[%s579_s27 + $0x68] sm:$0xff]  ;;  %v216_v27 = vld [vmem:[%s579_s27 + $0x70] sm:$0xff] }
  0x17   : > { %v441_v26 = vpack.c.bf16 %v215_v25, %v214_v24  ;;  %v217_v28 = vld [vmem:[%s579_s27 + $0x78] sm:$0xff]  ;;  %v218_v30 = vld [vmem:[%s579_s27 + $0x80] sm:$0xff]  ;;  %v219_v31 = vld [vmem:[%s579_s27 + $0x88] sm:$0xff] }
  0x18   : > { %v444_v29 = vpack.c.bf16 %v217_v28, %v216_v27  ;;  %v447_v32 = vpack.c.bf16 %v219_v31, %v218_v30 }
  0x19   : > { %427 = vmatpush1.bf16.msra.mxu0 %v426_v11  ;;  %459 = vmatpush1.bf16.msra.mxu1 %v426_v11 }
  0x1a   : > { %428 = vmatprep.subr.bf16.mxu0 %v519_v2  ;;  %451 = vmatprep.subr.bf16.mxu1 %v519_v2 }
  0x1d   : > { %430 = vmatpush1.bf16.msra.mxu0 %v429_v14  ;;  %460 = vmatpush1.bf16.msra.mxu1 %v429_v14 }
  0x1e   : > { %431 = vmatprep.subr.bf16.mxu0 %v519_v2  ;;  %452 = vmatprep.subr.bf16.mxu1 %v519_v2 }
  0x21   : > { %433 = vmatpush1.bf16.msra.mxu0 %v432_v17  ;;  %461 = vmatpush1.bf16.msra.mxu1 %v432_v17 }
  0x22   : > { %434 = vmatprep.subr.bf16.mxu0 %v519_v2  ;;  %453 = vmatprep.subr.bf16.mxu1 %v519_v2 }
  0x25   : > { %436 = vmatpush1.bf16.msra.mxu0 %v435_v20  ;;  %462 = vmatpush1.bf16.msra.mxu1 %v435_v20 }
  0x26   : > { %437 = vmatprep.subr.bf16.mxu0 %v519_v2  ;;  %454 = vmatprep.subr.bf16.mxu1 %v519_v2 }
  0x29   : > { %439 = vmatpush1.bf16.msra.mxu0 %v438_v23  ;;  %463 = vmatpush1.bf16.msra.mxu1 %v438_v23 }
  0x2a   : > { %440 = vmatprep.subr.bf16.mxu0 %v519_v2  ;;  %455 = vmatprep.subr.bf16.mxu1 %v519_v2 }
  0x2d   : > { %442 = vmatpush1.bf16.msra.mxu0 %v441_v26  ;;  %464 = vmatpush1.bf16.msra.mxu1 %v441_v26 }
  0x2e   : > { %443 = vmatprep.subr.bf16.mxu0 %v519_v2  ;;  %456 = vmatprep.subr.bf16.mxu1 %v519_v2 }
  0x31   : > { %445 = vmatpush1.bf16.msra.mxu0 %v444_v29  ;;  %465 = vmatpush1.bf16.msra.mxu1 %v444_v29 }
  0x32   : > { %446 = vmatprep.subr.bf16.mxu0 %v519_v2  ;;  %457 = vmatprep.subr.bf16.mxu1 %v519_v2 }
  0x35   : > { %448 = vmatpush1.bf16.msra.mxu0 %v447_v32  ;;  %466 = vmatpush1.bf16.msra.mxu1 %v447_v32 }
  0x38   : > { %308 = vmatmul.mubr.f32.vlgmr.msra.gmra.mrb[0].mxu0 %v220_v33  ;;  %313 = vmatmul.mubr.f32.vlgmr.msra.gmra.mrb[0].mxu1 %v222_v34 }
  0x89   : > { %v229_v35 = vpop.permute.xlu0 %228 }
  0x8d   : > { %v234_v36 = vpop.permute.xlu0 %233 }
 0x10b   : > { %v309_v37 = vpop.f32.mrb[0].mxu0  ;;  %v314_v38 = vpop.f32.mrb[0].mxu1 }
 0x10c   : > { %v310_v39 = vadd.f32 %v309_v37, %v229_v35  ;;  %v315_v40 = vadd.f32 %v314_v38, %v234_v36  ;;  %v311_v41 = vpop.f32.mrb[1].mxu0  ;;  %v316_v42 = vpop.f32.mrb[1].mxu1 }
 0x10e   : > { %vm318_vm1 = vcmp.ge.f32.partialorder %v310_v39, 0.0  ;;  %v320_v43 = vmul.f32 0.1, %v310_v39  ;;  %vm319_vm2 = vcmp.ge.f32.partialorder %v315_v40, 0.0  ;;  %v321_v44 = vmul.f32 0.1, %v315_v40 }
 0x110   : > { %v322_v45 = vsel %vm318_vm1, %v310_v39, %v320_v43  ;;  %v323_v46 = vsel %vm319_vm2, %v315_v40, %v321_v44 }
 0x111   : > { %324 = vst [vmem:[%s201_s8] sm:$0xff] %v322_v45  ;;  %325 = vst [vmem:[%s201_s8 + $0x8] sm:$0xff] %v323_v46 }
 0x112 PF: > { %s13_s14 = sadd.s32 1, %s517_s14   ;;  %s638_s12 = smov %s513_s13 }
 0x113   : > { %p10_p5 = scmp.ge.s32.totalorder %s13_s14, 4   ;;  %s639_s13 = smov %s641_s15 }
 0x115   :  { %12 = sbr.rel (!%p10_p5) target bundleno = 2 (0x2), region = 62 }

// kernel: forward.13
= control target key start
LH: loop header
LB: loop body
LE: loop exit
PB: predicated region body
PF: predicated region fallthrough
CT: control target
= control target key end

     0   :  { %s679_s18 = smov 0   ;;  %s681_s19 = smov 0   ;;  %s755_s0 = inlined_call_operand.vmem [shape: f32[2,144,128], index: 0, kind: input, shape index: {}]   ;;  %s756_s1 = inlined_call_operand.vmem [shape: f32[8,144], index: 1, kind: input, shape index: {}]   ;;  %s757_s2 = inlined_call_operand.vmem [shape: f32[1,8,1], index: 2, kind: input, shape index: {}]   ;;  %s758_s3 = inlined_call_operand.vmem [shape: f32[3,8], index: 3, kind: input, shape index: {}]   ;;  %s759_s4 = inlined_call_operand.vmem [shape: f32[2,3,1], index: 4, kind: input, shape index: {}]   ;;  %s760_s5 = inlined_call_operand.vmem [shape: f32[2,3,128], index: 5, kind: output, shape index: {}]  }
   0x1   :  { %s683_s20 = smov 0  }
   0x2 LB: > { %s27_s21 = sadd.s32 1, %s639_s19  ;;  %p549_p0 = scmp.ge.s32.totalorder %s643_s20, 1  ;;  %s643_s20 = sphi %s683_s20, %s15_s20   ;;  %s639_s19 = sphi %s681_s19, %s762_s19   ;;  %s635_s18 = sphi %s679_s18, %s761_s18  }
   0x3   : > { %p29_p1 = scmp.ge.s32.totalorder %s27_s21, 2  ;;  %p215_p2 = scmp.lt.s32.totalorder %s643_s20, 3 }
   0x5   : > { %s764_s21 = smov (%p29_p1, %s27_s21), 0  ;;  %p216_p3 = pnand %p549_p0, %p215_p2 }
   0x6   : > { %p252_p4 = scmp.lt.s32.totalorder (!%p216_p3), %s635_s18, 1  ;;  %v290_v0 = vld [vmem:[%s756_s1 + $0x8] sm:$0xff] (!%p216_p3)  ;;  %vm297_vm0 = vcmask (!%p216_p3), 130048   ;;  %v645_v1 = vmov (!%p216_p3), 0.0|0.0   ;;  %v291_v2 = vld [vmem:[%s757_s2] sm:$0xff] (!%p216_p3)  ;;  %v646_v3 = vmov (!%p216_p3), 0  }
   0x7   : > { %219 = sbr.rel (%p216_p3) target bundleno = 489 (0x1e9), region = 40  ;;  %564 = vmatprep.subr.bf16.mxu0 (!%p216_p3), %v645_v1  ;;  %553 = vmatprep.mubr.msk.f32.mxu0 (!%p216_p3), %vm297_vm0, %v290_v0  ;;  %v289_v32 = vld [vmem:[%s756_s1] sm:$0xff] (!%p216_p3)  ;;  %v647_v33 = vmov (!%p216_p3), 0.0   ;;  %vm648_vm1 = vmmov (!%p216_p3), 0   ;;  %vm381_vm3 = vcmask (!%p216_p3), 64512  }
   0x8   : > { %620 = vset.pattern.permute.xlu0 (!%p216_p3), %v646_v3  ;;  %559 = vmatprep.subr.mxu1 (!%p216_p3), %v647_v33  ;;  %v374_v39 = vld [vmem:[%s758_s3] sm:$0x7] (!%p216_p3) }
   0x9   : > { %294 = vperm.xlu0 (!%p216_p3), %620, %v291_v2   ;;  %561 = vmatprep.mubr.msk.f32.mxu1 (!%p216_p3), %vm648_vm1, %v647_v33 }
   0xe   : > { %s766_s18 = smov (!%p252_p4, %s635_s18), 1 }
   0xf   : > { %s591_s26 = smul.u32 144, %s766_s18  ;;  %s551_s27 = sshll.u32 %s766_s18, 2 }
  0x10   : > { %s263_s30 = scalar_lea.vmem %s759_s4, %s551_s27  ;;  %s270_s15 = scalar_lea.vmem %s760_s5, %s551_s27 }
  0x11   : > { %s715_s8 = scalar_lea.vmem %s755_s0, %s591_s26  ;;  %v375_v4 = vld [vmem:[%s263_s30] sm:$0x7] }
  0x12   : > { %v271_v5 = vld [vmem:[%s715_s8] sm:$0xff]  ;;  %v272_v6 = vld [vmem:[%s715_s8 + $0x8] sm:$0xff]  ;;  %v273_v7 = vld [vmem:[%s715_s8 + $0x10] sm:$0xff]  ;;  %378 = vperm.xlu0 %620, %v375_v4  }
  0x13   : > { %v565_v8 = vpack.c.bf16 %v272_v6, %v271_v5  ;;  %v274_v9 = vld [vmem:[%s715_s8 + $0x18] sm:$0xff]  ;;  %v275_v11 = vld [vmem:[%s715_s8 + $0x20] sm:$0xff]  ;;  %v276_v12 = vld [vmem:[%s715_s8 + $0x28] sm:$0xff] }
  0x14   : > { %v568_v10 = vpack.c.bf16 %v274_v9, %v273_v7  ;;  %v571_v13 = vpack.c.bf16 %v276_v12, %v275_v11  ;;  %v277_v14 = vld [vmem:[%s715_s8 + $0x30] sm:$0xff]  ;;  %v278_v15 = vld [vmem:[%s715_s8 + $0x38] sm:$0xff]  ;;  %v279_v17 = vld [vmem:[%s715_s8 + $0x40] sm:$0xff] }
  0x15   : > { %566 = vmatpush1.bf16.msra.mxu0 %v565_v8  ;;  %v574_v16 = vpack.c.bf16 %v278_v15, %v277_v14  ;;  %v280_v18 = vld [vmem:[%s715_s8 + $0x48] sm:$0xff]  ;;  %v281_v20 = vld [vmem:[%s715_s8 + $0x50] sm:$0xff]  ;;  %v282_v21 = vld [vmem:[%s715_s8 + $0x58] sm:$0xff] }
  0x16   : > { %567 = vmatprep.subr.bf16.mxu0 %v645_v1  ;;  %v577_v19 = vpack.c.bf16 %v280_v18, %v279_v17  ;;  %v580_v22 = vpack.c.bf16 %v282_v21, %v281_v20  ;;  %v283_v23 = vld [vmem:[%s715_s8 + $0x60] sm:$0xff]  ;;  %v284_v24 = vld [vmem:[%s715_s8 + $0x68] sm:$0xff]  ;;  %v285_v26 = vld [vmem:[%s715_s8 + $0x70] sm:$0xff] }
  0x17   : > { %v583_v25 = vpack.c.bf16 %v284_v24, %v283_v23  ;;  %v286_v27 = vld [vmem:[%s715_s8 + $0x78] sm:$0xff]  ;;  %v287_v29 = vld [vmem:[%s715_s8 + $0x80] sm:$0xff]  ;;  %v288_v30 = vld [vmem:[%s715_s8 + $0x88] sm:$0xff] }
  0x18   : > { %v586_v28 = vpack.c.bf16 %v286_v27, %v285_v26  ;;  %v589_v31 = vpack.c.bf16 %v288_v30, %v287_v29 }
  0x19   : > { %569 = vmatpush1.bf16.msra.mxu0 %v568_v10 }
  0x1a   : > { %570 = vmatprep.subr.bf16.mxu0 %v645_v1 }
  0x1d   : > { %572 = vmatpush1.bf16.msra.mxu0 %v571_v13 }
  0x1e   : > { %573 = vmatprep.subr.bf16.mxu0 %v645_v1 }
  0x21   : > { %575 = vmatpush1.bf16.msra.mxu0 %v574_v16 }
  0x22   : > { %576 = vmatprep.subr.bf16.mxu0 %v645_v1 }
  0x25   : > { %578 = vmatpush1.bf16.msra.mxu0 %v577_v19 }
  0x26   : > { %579 = vmatprep.subr.bf16.mxu0 %v645_v1 }
  0x29   : > { %581 = vmatpush1.bf16.msra.mxu0 %v580_v22 }
  0x2a   : > { %582 = vmatprep.subr.bf16.mxu0 %v645_v1 }
  0x2d   : > { %584 = vmatpush1.bf16.msra.mxu0 %v583_v25 }
  0x2e   : > { %585 = vmatprep.subr.bf16.mxu0 %v645_v1 }
  0x31   : > { %587 = vmatpush1.bf16.msra.mxu0 %v586_v28 }
  0x32   : > { %588 = vmatprep.subr.bf16.mxu0 %v645_v1 }
  0x35   : > { %590 = vmatpush1.bf16.msra.mxu0 %v589_v31 }
  0x38   : > { %366 = vmatmul.mubr.f32.vlgmr.msra.gmra.mrb[0].mxu0 %v289_v32 }
  0x88   : > { %v295_v34 = vpop.permute.xlu0 %294 }
  0x91   : > { %v379_v41 = vpop.permute.xlu0 %378 }
 0x10b   : > { %v367_v35 = vpop.f32.mrb[0].mxu0 }
 0x10c   : > { %v368_v36 = vadd.f32 %v367_v35, %v295_v34  ;;  %v369_v37 = vpop.f32.mrb[1].mxu0 }
 0x10e   : > { %vm371_vm2 = vcmp.ge.f32.partialorder %v368_v36, 0.0  ;;  %v372_v38 = vmul.f32 0.1, %v368_v36 }
 0x110   : > { %v373_v40 = vsel %vm371_vm2, %v368_v36, %v372_v38 }
 0x111   : > { %560 = vmatpush3.msra.mxu1 %v373_v40 }
 0x112   : > { %562 = vmatmul.mubr.msk.f32.vlgmr.msra.gmra.mrb[0].mxu1 %vm381_vm3, %v374_v39 }
 0x1e5   : > { %v451_v42 = vpop.f32.mrb[0].mxu1 }
 0x1e6   : > { %v452_v43 = vadd.f32 %v451_v42, %v379_v41  ;;  %v563_v44 = vpop.f32.mrb[1].mxu1 }
 0x1e8   : > { %455 = vst [vmem:[%s270_s15] sm:$0x7] %v452_v43 }
 0x1e9 PF: > { %s15_s20 = sadd.s32 1, %s643_s20   ;;  %s761_s18 = smov %s639_s19 }
 0x1ea   : > { %p12_p5 = scmp.ge.s32.totalorder %s15_s20, 4   ;;  %s762_s19 = smov %s764_s21 }
 0x1ec   :  { %14 = sbr.rel (!%p12_p5) target bundleno = 2 (0x2), region = 73 }

</bundles_post_ra>
